<compile_context>
chip_gen: v5e
topology: v5e:2x2
jax: 0.10.0
libtpu: 0.0.40
codegen_flags: <defaults>
</compile_context>

<pallas_src>
import jax
import jax.numpy as jnp
from jax.experimental import pallas as pl
from jax.experimental.pallas import tpu as pltpu

EPS = 1e-5  # nn.LayerNorm default


def _round_up(x, m):
    return (x + m - 1) // m * m


# ----------------------------------------------------------------------------
# Kernels
# ----------------------------------------------------------------------------
def _layernorm_rows(x, gamma, beta):
    # Two-pass moments (matches nn.LayerNorm; avoids E[x^2]-mean^2 cancellation).
    inv_d = jnp.float32(1.0 / x.shape[-1])
    mean = jnp.sum(x, axis=-1, keepdims=True) * inv_d
    xc = x - mean
    var = jnp.sum(xc * xc, axis=-1, keepdims=True) * inv_d
    y = xc * jax.lax.rsqrt(var + EPS)
    return y * gamma + beta


def _prenorm_linear_single_kernel(x_ref, gamma_ref, beta_ref, w_ref, b_ref, o_ref):
    # Whole weight resident (constant block index -> fetched from HBM once).
    # x_ref: (tm, D) input rows, w_ref: (D, D) bf16, o_ref: (tm, D).
    x = x_ref[...].astype(jnp.float32)
    y = _layernorm_rows(
        x, gamma_ref[...].astype(jnp.float32), beta_ref[...].astype(jnp.float32)
    )
    out = jnp.dot(y.astype(w_ref.dtype), w_ref[...], preferred_element_type=jnp.float32)
    o_ref[...] = (out + b_ref[...].astype(jnp.float32)).astype(o_ref.dtype)


def _prenorm_linear_tiled_kernel(x_ref, gamma_ref, beta_ref, w_ref, b_ref, o_ref, y_ref):
    # Column-tiled weight (D, tn); LayerNorm output cached across j in y_ref.
    j = pl.program_id(1)

    @pl.when(j == 0)
    def _():
        x = x_ref[...].astype(jnp.float32)
        y = _layernorm_rows(
            x, gamma_ref[...].astype(jnp.float32), beta_ref[...].astype(jnp.float32)
        )
        y_ref[...] = y.astype(y_ref.dtype)  # cache as bf16 for the MXU

    out = jnp.dot(y_ref[...], w_ref[...], preferred_element_type=jnp.float32)
    o_ref[...] = (out + b_ref[...].astype(jnp.float32)).astype(o_ref.dtype)


# ----------------------------------------------------------------------------
# Tile selection
# ----------------------------------------------------------------------------
def _pick_tiles(R, D, out_bytes, vmem_cap):
    """Choose (tm, tn, single_j, vmem_limit) from the per-chip VMEM capacity."""
    vmem_budget = int(vmem_cap * 0.75)  # headroom for compiler-internal scratch
    small_vmem = vmem_cap <= 64 * 1024 * 1024  # v7x-class
    weight_cap = (8 if small_vmem else 16) * 1024 * 1024
    max_tm = 512 if small_vmem else 1024

    full_weight = 2 * D * D * 2  # double-buffered bf16 D x D
    # Single-j path whenever the full weight fits the cap, or when D has no
    # lane-dense (multiple-of-128) divisor to column-tile with.
    single_j = (full_weight <= weight_cap) or (D % 128 != 0)

    if single_j:
        tn = D
    else:
        tn = 128
        for cand in range(D // 128, 0, -1):
            c = cand * 128
            if D % c == 0 and 2 * D * c * 2 <= weight_cap:
                tn = c
                break

    misc = 8 * D * 4  # gamma / beta / bias (+ double buffering), generous
    r_cap = _round_up(R, 8)

    def footprint(tm):
        if single_j:
            return (2 * tm * D * 4            # x (double buffered)
                    + 2 * tm * D * out_bytes  # out (double buffered)
                    + full_weight + misc)
        return (2 * tm * D * 4
                + tm * D * 2                  # bf16 y scratch
                + 2 * tm * tn * out_bytes
                + 2 * D * tn * 2 + misc)

    tm = 8
    for cand in (1024, 512, 256, 128, 64, 32, 16, 8):
        if cand > max_tm:
            continue
        t = _round_up(min(cand, r_cap), 8)
        if footprint(t) <= vmem_budget:
            tm = t
            break
    # TODO(synk): if D is huge and not a multiple of 128 the full-weight path
    # may still not fit the budget; such shapes do not occur in bev_mobvit.

    vmem_limit = min(vmem_budget, max(32 * 1024 * 1024, int(footprint(tm) * 1.5)))
    return tm, tn, single_j, vmem_limit


# ----------------------------------------------------------------------------
# Wrapper
# ----------------------------------------------------------------------------
def prenorm_linear(x, gamma, beta, w, b):
    """x: (B, N, D). Returns fn(LayerNorm(x)) with fn = Linear(D, D)."""
    B, N, D = x.shape
    R = B * N
    x2 = x.reshape(R, D)
    out_dtype = x.dtype
    out_bytes = jnp.dtype(out_dtype).itemsize

    try:
        vmem_cap = int(pltpu.get_tpu_info().vmem_capacity_bytes)
    except Exception:
        vmem_cap = 64 * 1024 * 1024  # conservative fallback (v7x-sized)

    tm, tn, single_j, vmem_limit = _pick_tiles(R, D, out_bytes, vmem_cap)

    gamma2 = gamma.reshape(1, D).astype(jnp.float32)
    beta2 = beta.reshape(1, D).astype(jnp.float32)
    w_bf16 = w.astype(jnp.bfloat16)  # bf16 MXU peak + half the weight DMA
    b2 = b.reshape(1, D).astype(jnp.float32)

    n_i = pl.cdiv(R, tm)

    if single_j:
        grid = (n_i,)
        in_specs = [
            pl.BlockSpec((tm, D), lambda i: (i, 0)),   # x rows
            pl.BlockSpec((1, D), lambda i: (0, 0)),    # gamma
            pl.BlockSpec((1, D), lambda i: (0, 0)),    # beta
            pl.BlockSpec((D, D), lambda i: (0, 0)),    # full weight, fetched once
            pl.BlockSpec((1, D), lambda i: (0, 0)),    # bias
        ]
        out_specs = pl.BlockSpec((tm, D), lambda i: (i, 0))
        scratch_shapes = []
        kernel = _prenorm_linear_single_kernel
        dims = ("parallel",)
        weight_streams = 1
    else:
        grid = (n_i, D // tn)
        in_specs = [
            pl.BlockSpec((tm, D), lambda i, j: (i, 0)),   # x rows (const over j)
            pl.BlockSpec((1, D), lambda i, j: (0, 0)),    # gamma
            pl.BlockSpec((1, D), lambda i, j: (0, 0)),    # beta
            pl.BlockSpec((D, tn), lambda i, j: (0, j)),   # weight column tile
            pl.BlockSpec((1, tn), lambda i, j: (0, j)),   # bias tile
        ]
        out_specs = pl.BlockSpec((tm, tn), lambda i, j: (i, j))
        scratch_shapes = [pltpu.VMEM((tm, D), jnp.bfloat16)]
        kernel = _prenorm_linear_tiled_kernel
        dims = ("parallel", "arbitrary")
        weight_streams = n_i  # weight re-streamed once per row block

    cost = pl.CostEstimate(
        flops=int(2 * R * D * D + 10 * R * D),
        transcendentals=int(R),  # one rsqrt per row
        bytes_accessed=int(R * D * 4 + R * D * out_bytes
                           + weight_streams * D * D * 2 + 4 * D * 4),
    )

    out = pl.pallas_call(
        kernel,
        out_shape=jax.ShapeDtypeStruct((R, D), out_dtype),
        grid_spec=pltpu.PrefetchScalarGridSpec(
            num_scalar_prefetch=0,
            grid=grid,
            in_specs=in_specs,
            out_specs=out_specs,
            scratch_shapes=scratch_shapes,
        ),
        compiler_params=pltpu.CompilerParams(
            dimension_semantics=dims,
            vmem_limit_bytes=vmem_limit,
        ),
        cost_estimate=cost,
    )(x2, gamma2, beta2, w_bf16, b2)

    return out.reshape(B, N, D)


# ----------------------------------------------------------------------------
# Reference + test
# ----------------------------------------------------------------------------
def _reference(x, gamma, beta, w, b):
    mean = jnp.mean(x, axis=-1, keepdims=True)
    var = jnp.mean((x - mean) ** 2, axis=-1, keepdims=True)
    y = (x - mean) / jnp.sqrt(var + EPS) * gamma + beta
    return jnp.einsum("bnd,de->bne", y, w) + b


if __name__ == "__main__":
    key = jax.random.PRNGKey(0)
    B, N, D = 2, 8, 32  # batch=2, seq=8, hidden(dim)=32

    k_x, k_w, k_b, k_g = jax.random.split(key, 4)
    x = jax.random.normal(k_x, (B, N, D), dtype=jnp.float32)

    # nn.LayerNorm(dim) params: weight=1, bias=0 at init; perturb deterministically.
    gamma = jnp.ones((D,), jnp.float32) + 0.01 * jax.random.normal(k_g, (D,), jnp.float32)
    beta = jnp.zeros((D,), jnp.float32)

    # fn = Linear(dim, dim), deterministic init.
    w = 0.02 * jax.random.normal(k_w, (D, D), dtype=jnp.float32)
    b = 0.01 * jax.random.normal(k_b, (D,), dtype=jnp.float32)

    out = prenorm_linear(x, gamma, beta, w, b)
    out = jax.block_until_ready(out)

    ref = _reference(x, gamma, beta, w, b)
    assert out.shape == (B, N, D)
    # Tolerance loosened vs. pure-f32: matmul operands are bf16 (f32 accumulate).
    assert jnp.max(jnp.abs(out - ref)) < 1e-2

    print("KERNEL_OK")
</pallas_src>

<mosaic_0001>
module attributes {stable_mosaic.version = 11 : i64} {
  func.func @_prenorm_linear_single_kernel(%arg0: i32, %arg1: memref<16x32xf32, #tpu.memory_space<vmem>>, %arg2: memref<1x32xf32, #tpu.memory_space<vmem>>, %arg3: memref<1x32xf32, #tpu.memory_space<vmem>>, %arg4: memref<32x32xbf16, #tpu.memory_space<vmem>>, %arg5: memref<1x32xf32, #tpu.memory_space<vmem>>, %arg6: memref<16x32xf32, #tpu.memory_space<vmem>>) attributes {dimension_semantics = [#tpu.dimension_semantics<parallel>], iteration_bounds = array<i64: 1>, scalar_prefetch = 0 : i64, scratch_operands = 0 : i64, tpu.core_type = #tpu.core_type<tc>, window_params = [{transform_indices = @transform_0, window_bounds = array<i64: 16, 32>}, {pipeline_mode = #tpu.pipeline_mode<synchronous>, transform_indices = @transform_1, window_bounds = array<i64: 1, 32>}, {pipeline_mode = #tpu.pipeline_mode<synchronous>, transform_indices = @transform_2, window_bounds = array<i64: 1, 32>}, {pipeline_mode = #tpu.pipeline_mode<synchronous>, transform_indices = @transform_3, window_bounds = array<i64: 32, 32>}, {pipeline_mode = #tpu.pipeline_mode<synchronous>, transform_indices = @transform_4, window_bounds = array<i64: 1, 32>}, {transform_indices = @transform_5, window_bounds = array<i64: 16, 32>}]} {
    %c0 = arith.constant 0 : index
    %c0_0 = arith.constant 0 : index
    %0 = vector.load %arg1[%c0, %c0_0] : memref<16x32xf32, #tpu.memory_space<vmem>>, vector<16x32xf32>
    %c0_1 = arith.constant 0 : index
    %c0_2 = arith.constant 0 : index
    %1 = vector.load %arg2[%c0_1, %c0_2] : memref<1x32xf32, #tpu.memory_space<vmem>>, vector<1x32xf32>
    %c0_3 = arith.constant 0 : index
    %c0_4 = arith.constant 0 : index
    %2 = vector.load %arg3[%c0_3, %c0_4] : memref<1x32xf32, #tpu.memory_space<vmem>>, vector<1x32xf32>
    %cst = arith.constant dense<0.000000e+00> : vector<16xf32>
    %3 = vector.multi_reduction <add>, %0, %cst [1] : vector<16x32xf32> to vector<16xf32>
    %4 = vector.shape_cast %3 : vector<16xf32> to vector<16x1xf32>
    %cst_5 = arith.constant 3.125000e-02 : f32
    %5 = vector.broadcast %cst_5 : f32 to vector<16x1xf32>
    %6 = arith.mulf %4, %5 : vector<16x1xf32>
    %7 = vector.broadcast %6 : vector<16x1xf32> to vector<16x32xf32>
    %8 = arith.subf %0, %7 : vector<16x32xf32>
    %9 = arith.mulf %8, %8 : vector<16x32xf32>
    %cst_6 = arith.constant dense<0.000000e+00> : vector<16xf32>
    %10 = vector.multi_reduction <add>, %9, %cst_6 [1] : vector<16x32xf32> to vector<16xf32>
    %11 = vector.shape_cast %10 : vector<16xf32> to vector<16x1xf32>
    %cst_7 = arith.constant 3.125000e-02 : f32
    %12 = vector.broadcast %cst_7 : f32 to vector<16x1xf32>
    %13 = arith.mulf %11, %12 : vector<16x1xf32>
    %cst_8 = arith.constant 9.99999974E-6 : f32
    %14 = vector.broadcast %cst_8 : f32 to vector<16x1xf32>
    %15 = arith.addf %13, %14 : vector<16x1xf32>
    %16 = math.rsqrt %15 : vector<16x1xf32>
    %17 = vector.broadcast %16 : vector<16x1xf32> to vector<16x32xf32>
    %18 = arith.mulf %8, %17 : vector<16x32xf32>
    %19 = vector.broadcast %1 : vector<1x32xf32> to vector<16x32xf32>
    %20 = arith.mulf %18, %19 : vector<16x32xf32>
    %21 = vector.broadcast %2 : vector<1x32xf32> to vector<16x32xf32>
    %22 = arith.addf %20, %21 : vector<16x32xf32>
    %23 = arith.truncf %22 : vector<16x32xf32> to vector<16x32xbf16>
    %c0_9 = arith.constant 0 : index
    %c0_10 = arith.constant 0 : index
    %24 = vector.load %arg4[%c0_9, %c0_10] : memref<32x32xbf16, #tpu.memory_space<vmem>>, vector<32x32xbf16>
    %cst_11 = arith.constant dense<0.000000e+00> : vector<16x32xf32>
    %25 = tpu.matmul %23, %24, %cst_11 {dimension_numbers = #tpu.dot_dimension_numbers<[1], [0], [0], [1], [0, 0, 1, 1], [], []>} : vector<16x32xbf16>, vector<32x32xbf16>, vector<16x32xf32> -> vector<16x32xf32>
    %c0_12 = arith.constant 0 : index
    %c0_13 = arith.constant 0 : index
    %26 = vector.load %arg5[%c0_12, %c0_13] : memref<1x32xf32, #tpu.memory_space<vmem>>, vector<1x32xf32>
    %27 = vector.broadcast %26 : vector<1x32xf32> to vector<16x32xf32>
    %28 = arith.addf %25, %27 : vector<16x32xf32>
    %c0_14 = arith.constant 0 : index
    %c0_15 = arith.constant 0 : index
    %29 = vector.load %arg6[%c0_14, %c0_15] : memref<16x32xf32, #tpu.memory_space<vmem>>, vector<16x32xf32>
    tpu.vector_store %arg6[%c0_14, %c0_15], %28 {strides = array<i32>} : memref<16x32xf32, #tpu.memory_space<vmem>>, vector<16x32xf32>,
    return
  }
  func.func @transform_0(%arg0: i32) -> (i32, i32) {
    %c0_i32 = arith.constant 0 : i32
    %c0_i32_0 = arith.constant 0 : i32
    return %arg0, %c0_i32 : i32, i32
  }
  func.func @transform_1(%arg0: i32) -> (i32, i32) {
    %c0_i32 = arith.constant 0 : i32
    %c0_i32_0 = arith.constant 0 : i32
    %c0_i32_1 = arith.constant 0 : i32
    return %c0_i32, %c0_i32_0 : i32, i32
  }
  func.func @transform_2(%arg0: i32) -> (i32, i32) {
    %c0_i32 = arith.constant 0 : i32
    %c0_i32_0 = arith.constant 0 : i32
    %c0_i32_1 = arith.constant 0 : i32
    return %c0_i32, %c0_i32_0 : i32, i32
  }
  func.func @transform_3(%arg0: i32) -> (i32, i32) {
    %c0_i32 = arith.constant 0 : i32
    %c0_i32_0 = arith.constant 0 : i32
    %c0_i32_1 = arith.constant 0 : i32
    return %c0_i32, %c0_i32_0 : i32, i32
  }
  func.func @transform_4(%arg0: i32) -> (i32, i32) {
    %c0_i32 = arith.constant 0 : i32
    %c0_i32_0 = arith.constant 0 : i32
    %c0_i32_1 = arith.constant 0 : i32
    return %c0_i32, %c0_i32_0 : i32, i32
  }
  func.func @transform_5(%arg0: i32) -> (i32, i32) {
    %c0_i32 = arith.constant 0 : i32
    %c0_i32_0 = arith.constant 0 : i32
    return %arg0, %c0_i32 : i32, i32
  }
}

</mosaic_0001>

<bundles_post_ra>
// kernel: tpu_custom_call.1
= control target key start
LH: loop header
LB: loop body
LE: loop exit
PB: predicated region body
PF: predicated region fallthrough
CT: control target
= control target key end

     0   :  { %10 = vsyncpa [#allocation3], 0  ;;  %s383_s0 = inlined_call_operand.hbm [shape: f32[16,32], index: 0, kind: input, shape index: {}]   ;;  %s384_s1 = inlined_call_operand.hbm [shape: f32[1,32], index: 1, kind: input, shape index: {}]   ;;  %s385_s2 = inlined_call_operand.vmem [shape: f32[1,32], index: 2, kind: input, shape index: {}]   ;;  %s386_s3 = inlined_call_operand.hbm [shape: bf16[32,32], index: 3, kind: input, shape index: {}]   ;;  %s387_s4 = inlined_call_operand.vmem [shape: f32[1,32], index: 4, kind: input, shape index: {}]   ;;  %s388_s5 = inlined_call_operand.hbm [shape: f32[16,32], index: 5, kind: output, shape index: {}]  }
   0x1   :  { %11 = vsyncpa [#allocation6], 0  ;;  %s31_s20 = sshll.u32 %s384_s1, 4  ;;  %s32_s20 = int_to_ptr.hbm [resolvable:$true] %s31_s20 }
   0x2   :  { %12 = vsyncpa [#allocation4], 0  ;;  %s314_s21 = smov [#allocation5]   ;;  %s17_s25 = sshll.u32 %s383_s0, 4  ;;  %s18_s25 = int_to_ptr.hbm [resolvable:$true] %s17_s25 }
   0x3   :  { %s33_s22 = sshll.u32 %s314_s21, 4  ;;  %s315_s26 = smov [#allocation2]   ;;  %s34_s22 = int_to_ptr.vmem [resolvable:$true] %s33_s22 }
   0x4   :  { %36 = dma.hbm_to_vmem [thread:$0]  %s32_s20, 16, %s34_s22, [#allocation6]  }
   0x5   :  { %s19_s27 = sshll.u32 %s315_s26, 4  ;;  %s316_s28 = smov 128   ;;  %s20_s27 = int_to_ptr.vmem [resolvable:$true] %s19_s27 }
   0x6   :  { %s317_s29 = smov 8   ;;  %s43_s6 = sshll.u32 %s386_s3, 4  ;;  %s44_s6 = int_to_ptr.hbm [resolvable:$true] %s43_s6 }
   0x7   :  { %25 = dma.hbm_to_vmem [thread:$0]  %s18_s25, 256, %s20_s27, [#allocation3], %s316_s28, %s316_s28, %s317_s29  }
   0x8   :  { %s318_s7 = smov [#allocation7]   ;;  %s319_s0 = smov 64  }
   0x9   :  { %s45_s8 = sshll.u32 %s318_s7, 4  ;;  %s320_s9 = smov 4   ;;  %s46_s8 = int_to_ptr.vmem [resolvable:$true] %s45_s8 }
   0xa   :  { %51 = dma.hbm_to_vmem [thread:$0]  %s44_s6, 256, %s46_s8, [#allocation6], %s319_s0, %s319_s0, %s320_s9  }
   0xb   :  { %308 = dma.done.wait [#allocation3], 256  }
   0xc   :  { %309 = vsyncadd [#allocation3], 4294967040 }
   0xd   :  { %310 = dma.done.wait [#allocation6], 272  }
   0xe   :  { %311 = vsyncadd [#allocation6], 4294967024  ;;  %vm71_vm0 = vcmask 261120   ;;  %v67_v0 = vld [vmem:[#allocation2] sm:$0xff]  ;;  %v68_v2 = vld [vmem:[#allocation2 + $0x8] sm:$0xff]  ;;  %s321_s13 = smov [#allocation8]  }
   0xf   :  { %v72_v1 = vsel %vm71_vm0, %v67_v0, 0.0  ;;  %v75_v3 = vsel %vm71_vm0, %v68_v2, 0.0  ;;  %v196_v14 = vld [vmem:[#allocation7 + $0x8] sm:$0xff]  ;;  %v195_v16 = vld [vmem:[#allocation7] sm:$0xff]  ;;  %v205_v35 = vld [vmem:[#allocation5] ss:$0 sm:$0xff] }
  0x10   :  { %73 = vadd.xlane.f32.xlu0 %v72_v1  ;;  %156 = vmatpush.bf16.msra.mxu0 %v196_v14  ;;  %v206_v40 = vld [vmem:[%s385_s2] ss:$0 sm:$0xff]  ;;  %s170_s14 = sshll.u32 %s321_s13, 4  ;;  %s172_s2 = sshll.u32 %s388_s5, 4  ;;  %s171_s14 = int_to_ptr.vmem [resolvable:$true] %s170_s14  ;;  %s173_s2 = int_to_ptr.hbm [resolvable:$true] %s172_s2 }
  0x11   :  { %v207_v45 = vld [vmem:[%s387_s4] ss:$0 sm:$0xff] }
  0x14   :  { %157 = vmatpush.bf16.msra.mxu0 %v195_v16 }
  0x18   :  { %76 = vadd.xlane.f32.xlu0 %v75_v3 }
  0x83   :  { %v74_v4 = vpop.xlane.xlu0 %73 }
  0x84   :  { %v78_v5 = vmul.f32 0.03125, %v74_v4 }
  0x86   :  { %v80_v6 = vsub.f32 %v67_v0, %v78_v5 }
  0x88   :  { %v82_v7 = vmul.f32 %v80_v6, %v80_v6 }
  0x8a   :  { %v84_v8 = vsel %vm71_vm0, %v82_v7, 0.0 }
  0x8b   :  { %85 = vadd.xlane.f32.xlu1 %v84_v8  ;;  %v77_v9 = vpop.xlane.xlu0 %76 }
  0x8c   :  { %v79_v10 = vmul.f32 0.03125, %v77_v9 }
  0x8e   :  { %v81_v11 = vsub.f32 %v68_v2, %v79_v10 }
  0x90   :  { %v83_v12 = vmul.f32 %v81_v11, %v81_v11 }
  0x92   :  { %v87_v13 = vsel %vm71_vm0, %v83_v12, 0.0 }
  0x93   :  { %88 = vadd.xlane.f32.xlu1 %v87_v13 }
  0xfe   :  { %v86_v15 = vpop.xlane.xlu1 %85 }
  0xff   :  { %v90_v17 = vmul.f32 0.03125, %v86_v15 }
 0x101   :  { %v92_v18 = vadd.f32 1e-05, %v90_v17 }
 0x103   :  { %208 = vrsqrt.f32 %v92_v18  ;;  %vm100_vm2 = vweird.f32 %v92_v18 }
 0x106   :  { %v89_v19 = vpop.xlane.xlu1 %88 }
 0x107   :  { %v91_v20 = vmul.f32 0.03125, %v89_v19 }
 0x109   :  { %v209_v21 = vpop.eup %208  ;;  %v93_v22 = vadd.f32 1e-05, %v91_v20 }
 0x10a   :  { %v95_v23 = vmul.f32 %v209_v21, %v92_v18  ;;  %vm101_vm1 = vweird.f32 %v209_v21 }
 0x10b   :  { %210 = vrsqrt.f32 %v93_v22  ;;  %vm102_vm3 = vmor %vm100_vm2, %vm101_vm1  ;;  %vm110_vm5 = vweird.f32 %v93_v22 }
 0x10c   :  { %v96_v24 = vmul.f32 %v209_v21, %v95_v23 }
 0x10e   :  { %v97_v25 = vmul.f32 0.5, %v96_v24 }
 0x110   :  { %v98_v26 = vsub.f32 1.5, %v97_v25 }
 0x111   :  { %v211_v27 = vpop.eup %210 }
 0x112   :  { %v99_v28 = vmul.f32 %v209_v21, %v98_v26  ;;  %v105_v29 = vmul.f32 %v211_v27, %v93_v22  ;;  %vm111_vm4 = vweird.f32 %v211_v27 }
 0x113   :  { %vm112_vm6 = vmor %vm110_vm5, %vm111_vm4 }
 0x114   :  { %v106_v30 = vmul.f32 %v211_v27, %v105_v29  ;;  %v103_v31 = vsel %vm102_vm3, %v209_v21, %v99_v28 }
 0x115   :  { %v114_v34 = vmul.f32 %v103_v31, %v80_v6 }
 0x116   :  { %v107_v32 = vmul.f32 0.5, %v106_v30 }
 0x117   :  { %v119_v39 = vmul.f32 %v205_v35, %v114_v34 }
 0x118   :  { %v108_v33 = vsub.f32 1.5, %v107_v32 }
 0x119   :  { %v124_v42 = vadd.f32 %v206_v40, %v119_v39 }
 0x11a   :  { %v109_v36 = vmul.f32 %v211_v27, %v108_v33 }
 0x11c   :  { %v113_v37 = vsel %vm112_vm6, %v211_v27, %v109_v36 }
 0x11d   :  { %v115_v38 = vmul.f32 %v113_v37, %v81_v11 }
 0x11f   :  { %v120_v41 = vmul.f32 %v205_v35, %v115_v38 }
 0x121   :  { %v125_v43 = vadd.f32 %v206_v40, %v120_v41 }
 0x123   :  { %v126_v44 = vpack.c.bf16 %v125_v43, %v124_v42 }
 0x125   :  { %194 = vmatmul.msk.bf16.vlgmr.msra.gmra.mxu0 %vm71_vm0, %v126_v44 }
 0x1a2   :  { %v159_v46 = vpop.f32.mrf.mxu0 }
 0x1a3   :  { %v160_v47 = vadd.f32 %v207_v45, %v159_v46 }
 0x1a5   :  { %164 = vst.msk [vmem:[#allocation8] sm:$0xff] %vm71_vm0, %v160_v47 }
 0x1aa   :  { %v161_v48 = vpop.f32.mrf.mxu0 }
 0x1ab   :  { %v162_v49 = vadd.f32 %v207_v45, %v161_v48 }
 0x1ad   :  { %165 = vst.msk [vmem:[#allocation8 + $0x8] sm:$0xff] %vm71_vm0, %v162_v49 }
 0x1ae   :  { %178 = dma.vmem_to_hbm [thread:$0]  %s171_s14, 256, %s173_s2, [#allocation4], %s316_s28, %s316_s28, %s317_s29  }
 0x1af   :  { %312 = dma.done.wait [#allocation4], 256  }
 0x1b0   :  { %313 = vsyncadd [#allocation4], 4294967040 }
 0x1b1   :  { %183 = vsyncpa [#allocation3], 1 }
 0x1b2   :  { %184 = vsyncpa [#allocation6], 1 }
 0x1b3   :  { %185 = vsyncpa [#allocation4], 1 }

</bundles_post_ra>
